<compile_context>
chip_gen: v6e
topology: v6e:2x2x1
jax: 0.10.0
libtpu: 0.0.40
codegen_flags: <defaults>
</compile_context>

<pallas_src>
import functools

import jax
import jax.numpy as jnp
from jax import lax
from jax.experimental import pallas as pl
from jax.experimental.pallas import tpu as pltpu

EPS = 1e-8  # torch.nn.CosineSimilarity default eps


def _patch_classifier_kernel(a_ref, b_ref, w1_ref, b1_ref, w2_ref, b2_ref, out_ref,
                             *, reduce_axis):
    # a_ref/b_ref: (TB, D, E) when reduce_axis == 1  (E on lanes; small-D layout)
    #              (TB, E, D) when reduce_axis == 2  (D on lanes; D % 128 == 0)
    a = a_ref[...].astype(jnp.float32)
    b = b_ref[...].astype(jnp.float32)

    # Cosine similarity over the feature axis D -> (TB, E).
    dot = jnp.sum(a * b, axis=reduce_axis)
    sa = jnp.sum(a * a, axis=reduce_axis)
    sb = jnp.sum(b * b, axis=reduce_axis)
    # max(sqrt(x), eps) == sqrt(max(x, eps^2)): fold two sqrts + a divide into a
    # single EUP rsqrt.  Each norm is clamped separately (current torch
    # F.cosine_similarity semantics); differs from product-clamp only for
    # near-zero vectors.
    cos = dot * lax.rsqrt(jnp.maximum(sa, EPS * EPS) * jnp.maximum(sb, EPS * EPS))

    # Linear(E -> H) + ReLU on the MXU.
    h = jnp.dot(cos, w1_ref[...], preferred_element_type=jnp.float32) + b1_ref[...]
    h = jnp.maximum(h, 0.0)                                       # (TB, H)

    # Linear(H -> 1) as (1, H) @ (TB, H)^T -> (1, TB): logits land lane-major so
    # the output store is a single lane-dense row.
    logits = lax.dot_general(
        w2_ref[...], h, (((1,), (1,)), ((), ())),
        preferred_element_type=jnp.float32) + b2_ref[...]         # (1, TB)

    # Sigmoid.
    out_ref[...] = 1.0 / (1.0 + jnp.exp(-logits))


def _vmem_capacity_bytes():
    try:
        return int(pltpu.get_tpu_info().vmem_capacity_bytes)
    except Exception:
        return 64 * 1024 * 1024  # conservative: v7x has 64 MiB per TensorCore


def _choose_batch_tile(B, E, D, itemsize, vmem_cap):
    """Largest batch tile whose pipeline + in-kernel working set fits VMEM."""
    # 2 inputs x 2 pipeline buffers of (TB, D, E) in the source dtype ...
    in_budget = vmem_cap // 4
    # ... plus ~6 f32-sized temporaries of the same tile inside the body
    # (a, b, and the three elementwise products before the reductions fuse).
    tmp_budget = (3 * vmem_cap) // 8
    per_row_in = 4 * E * D * itemsize
    per_row_tmp = 6 * E * D * 4
    cap_rows = min(in_budget // max(per_row_in, 1), tmp_budget // max(per_row_tmp, 1))
    cap_rows = max(int(cap_rows), 8)
    if B <= cap_rows:
        return B, B  # single tile: block shape == full array shape
    # Multiple tiles: TB must be a multiple of 128 so the (1, TB) output block is
    # legal and its stores are unmasked.
    tb = max(128, (min(cap_rows, 2048) // 128) * 128)
    b_pad = ((B + tb - 1) // tb) * tb
    return tb, b_pad


def patch_classifier(buggy_embedding, patch_embedding, w1, b1, w2, b2):
    """buggy/patch: (B, E, D); w1: (E, H); b1: (H,); w2: (H, 1); b2: (1,)."""
    B, E, D = buggy_embedding.shape
    H = w1.shape[1]
    itemsize = buggy_embedding.dtype.itemsize

    vmem_cap = _vmem_capacity_bytes()
    TB, B_pad = _choose_batch_tile(B, E, D, itemsize, vmem_cap)
    nb_tiles = B_pad // TB

    # Layout: put a lane-friendly axis last for the cosine reduction.
    d_on_lanes = (D >= 128) and (D % 128 == 0)
    if d_on_lanes:
        a_in, b_in = buggy_embedding, patch_embedding                # (B, E, D)
        blk = (TB, E, D)
        reduce_axis = 2
    else:
        # TODO(synk): in production the upstream producer should emit (B, D, E)
        # directly; here the swap is a one-off XLA transpose outside the kernel.
        a_in = jnp.swapaxes(buggy_embedding, 1, 2)                   # (B, D, E)
        b_in = jnp.swapaxes(patch_embedding, 1, 2)
        blk = (TB, D, E)
        reduce_axis = 1

    if B_pad != B:
        pad = ((0, B_pad - B), (0, 0), (0, 0))
        a_in = jnp.pad(a_in, pad)
        b_in = jnp.pad(b_in, pad)

    w1f = w1.astype(jnp.float32)                  # (E, H)
    b1f = b1.reshape(1, H).astype(jnp.float32)    # (1, H)
    w2f = w2.reshape(1, H).astype(jnp.float32)    # (1, H) row form of the (H, 1) weight
    b2f = b2.reshape(1, 1).astype(jnp.float32)    # (1, 1)

    # VMEM limit derived from the chosen tile (not a hard-coded 32 MiB).
    tile_bytes = 4 * TB * E * D * itemsize + 6 * TB * E * D * 4
    small_bytes = 2 * ((E * H + 2 * H + 1) * 4 + TB * 4)
    vmem_limit = int(max(32 << 20,
                         min(tile_bytes + small_bytes + (4 << 20),
                             int(vmem_cap * 0.9))))

    cost = pl.CostEstimate(
        flops=int(2 * B_pad * E * (3 * D + H) + 4 * B_pad * H),
        transcendentals=int(B_pad * E + B_pad),
        bytes_accessed=int(2 * B_pad * E * D * itemsize
                           + (E * H + 2 * H + 2) * 4 + B_pad * 4),
    )

    kernel = functools.partial(_patch_classifier_kernel, reduce_axis=reduce_axis)

    out_row = pl.pallas_call(
        kernel,
        out_shape=jax.ShapeDtypeStruct((1, B_pad), jnp.float32),
        grid=(nb_tiles,),
        in_specs=[
            pl.BlockSpec(blk, lambda i: (i, 0, 0)),     # buggy embedding tile
            pl.BlockSpec(blk, lambda i: (i, 0, 0)),     # patch embedding tile
            pl.BlockSpec((E, H), lambda i: (0, 0)),     # w1 (resident across tiles)
            pl.BlockSpec((1, H), lambda i: (0, 0)),     # b1
            pl.BlockSpec((1, H), lambda i: (0, 0)),     # w2 (row)
            pl.BlockSpec((1, 1), lambda i: (0, 0)),     # b2
        ],
        out_specs=pl.BlockSpec((1, TB), lambda i: (0, i)),
        compiler_params=pltpu.CompilerParams(
            dimension_semantics=("parallel",),
            vmem_limit_bytes=vmem_limit,
        ),
        cost_estimate=cost,
    )(a_in, b_in, w1f, b1f, w2f, b2f)

    # torch .squeeze(): (B, 1) -> (B,).  (For B == 1 torch would return a 0-d
    # scalar; we keep shape (B,) -- shape-only edge case.)
    return out_row[0, :B]


def reference(buggy, patch, w1, b1, w2, b2):
    a = buggy.astype(jnp.float32)
    b = patch.astype(jnp.float32)
    dot = jnp.sum(a * b, axis=2)
    na = jnp.sqrt(jnp.maximum(jnp.sum(a * a, axis=2), EPS * EPS))
    nb = jnp.sqrt(jnp.maximum(jnp.sum(b * b, axis=2), EPS * EPS))
    cos = dot / (na * nb)
    h = jnp.maximum(cos @ w1.astype(jnp.float32) + b1.astype(jnp.float32), 0.0)
    o = h @ w2.astype(jnp.float32) + b2.astype(jnp.float32)
    return jax.nn.sigmoid(o).squeeze()


if __name__ == "__main__":
    # Small, deterministic example shapes.
    B, E, D, H = 4, 8, 16, 32  # batch, embedding_dim, per-token feature dim, hidden_dim

    key = jax.random.PRNGKey(0)
    k1, k2, k3, k4, k5, k6 = jax.random.split(key, 6)

    buggy = jax.random.normal(k1, (B, E, D), dtype=jnp.float32)
    patch = jax.random.normal(k2, (B, E, D), dtype=jnp.float32)

    # Deterministic synthetic parameters.
    w1 = jax.random.normal(k3, (E, H), dtype=jnp.float32) * (1.0 / jnp.sqrt(E))
    b1 = jax.random.normal(k4, (H,), dtype=jnp.float32) * 0.01
    w2 = jax.random.normal(k5, (H, 1), dtype=jnp.float32) * (1.0 / jnp.sqrt(H))
    b2 = jax.random.normal(k6, (1,), dtype=jnp.float32) * 0.01

    # float32 path
    out = jax.block_until_ready(patch_classifier(buggy, patch, w1, b1, w2, b2))
    ref = reference(buggy, patch, w1, b1, w2, b2)
    assert out.shape == (B,), out.shape
    assert jnp.allclose(out, ref, atol=1e-5, rtol=1e-5), (out, ref)

    # bf16 embeddings: streamed at half the HBM traffic, cast to f32 inside the kernel.
    buggy16 = buggy.astype(jnp.bfloat16)
    patch16 = patch.astype(jnp.bfloat16)
    out16 = jax.block_until_ready(patch_classifier(buggy16, patch16, w1, b1, w2, b2))
    ref16 = reference(buggy16, patch16, w1, b1, w2, b2)
    assert out16.shape == (B,), out16.shape
    assert jnp.allclose(out16, ref16, atol=1e-4, rtol=1e-4), (out16, ref16)

    print("KERNEL_OK")
</pallas_src>

<mosaic_0001>
module attributes {stable_mosaic.version = 11 : i64} {
  func.func @_patch_classifier_kernel(%arg0: i32, %arg1: memref<4x16x8xf32, #tpu.memory_space<vmem>>, %arg2: memref<4x16x8xf32, #tpu.memory_space<vmem>>, %arg3: memref<8x32xf32, #tpu.memory_space<vmem>>, %arg4: memref<1x32xf32, #tpu.memory_space<vmem>>, %arg5: memref<1x32xf32, #tpu.memory_space<vmem>>, %arg6: memref<1x1xf32, #tpu.memory_space<vmem>>, %arg7: memref<1x4xf32, #tpu.memory_space<vmem>>) attributes {dimension_semantics = [#tpu.dimension_semantics<parallel>], iteration_bounds = array<i64: 1>, scalar_prefetch = 0 : i64, scratch_operands = 0 : i64, tpu.core_type = #tpu.core_type<tc>, window_params = [{transform_indices = @transform_0, window_bounds = array<i64: 4, 16, 8>}, {transform_indices = @transform_1, window_bounds = array<i64: 4, 16, 8>}, {pipeline_mode = #tpu.pipeline_mode<synchronous>, transform_indices = @transform_2, window_bounds = array<i64: 8, 32>}, {pipeline_mode = #tpu.pipeline_mode<synchronous>, transform_indices = @transform_3, window_bounds = array<i64: 1, 32>}, {pipeline_mode = #tpu.pipeline_mode<synchronous>, transform_indices = @transform_4, window_bounds = array<i64: 1, 32>}, {pipeline_mode = #tpu.pipeline_mode<synchronous>, transform_indices = @transform_5, window_bounds = array<i64: 1, 1>}, {transform_indices = @transform_6, window_bounds = array<i64: 1, 4>}]} {
    %c0 = arith.constant 0 : index
    %c0_0 = arith.constant 0 : index
    %c0_1 = arith.constant 0 : index
    %0 = vector.load %arg1[%c0, %c0_0, %c0_1] : memref<4x16x8xf32, #tpu.memory_space<vmem>>, vector<4x16x8xf32>
    %c0_2 = arith.constant 0 : index
    %c0_3 = arith.constant 0 : index
    %c0_4 = arith.constant 0 : index
    %1 = vector.load %arg2[%c0_2, %c0_3, %c0_4] : memref<4x16x8xf32, #tpu.memory_space<vmem>>, vector<4x16x8xf32>
    %2 = arith.mulf %0, %1 : vector<4x16x8xf32>
    %cst = arith.constant dense<0.000000e+00> : vector<4x8xf32>
    %3 = vector.multi_reduction <add>, %2, %cst [1] : vector<4x16x8xf32> to vector<4x8xf32>
    %4 = arith.mulf %0, %0 : vector<4x16x8xf32>
    %cst_5 = arith.constant dense<0.000000e+00> : vector<4x8xf32>
    %5 = vector.multi_reduction <add>, %4, %cst_5 [1] : vector<4x16x8xf32> to vector<4x8xf32>
    %6 = arith.mulf %1, %1 : vector<4x16x8xf32>
    %cst_6 = arith.constant dense<0.000000e+00> : vector<4x8xf32>
    %7 = vector.multi_reduction <add>, %6, %cst_6 [1] : vector<4x16x8xf32> to vector<4x8xf32>
    %cst_7 = arith.constant 1.000000e-16 : f32
    %8 = vector.broadcast %cst_7 : f32 to vector<4x8xf32>
    %9 = arith.maximumf %5, %8 : vector<4x8xf32>
    %cst_8 = arith.constant 1.000000e-16 : f32
    %10 = vector.broadcast %cst_8 : f32 to vector<4x8xf32>
    %11 = arith.maximumf %7, %10 : vector<4x8xf32>
    %12 = arith.mulf %9, %11 : vector<4x8xf32>
    %13 = math.rsqrt %12 : vector<4x8xf32>
    %14 = arith.mulf %3, %13 : vector<4x8xf32>
    %c0_9 = arith.constant 0 : index
    %c0_10 = arith.constant 0 : index
    %15 = vector.load %arg3[%c0_9, %c0_10] : memref<8x32xf32, #tpu.memory_space<vmem>>, vector<8x32xf32>
    %cst_11 = arith.constant dense<0.000000e+00> : vector<4x32xf32>
    %16 = tpu.matmul %14, %15, %cst_11 {dimension_numbers = #tpu.dot_dimension_numbers<[1], [0], [0], [1], [0, 0, 1, 1], [], []>} : vector<4x8xf32>, vector<8x32xf32>, vector<4x32xf32> -> vector<4x32xf32>
    %c0_12 = arith.constant 0 : index
    %c0_13 = arith.constant 0 : index
    %17 = vector.load %arg4[%c0_12, %c0_13] : memref<1x32xf32, #tpu.memory_space<vmem>>, vector<1x32xf32>
    %18 = vector.broadcast %17 : vector<1x32xf32> to vector<4x32xf32>
    %19 = arith.addf %16, %18 : vector<4x32xf32>
    %cst_14 = arith.constant 0.000000e+00 : f32
    %20 = vector.broadcast %cst_14 : f32 to vector<4x32xf32>
    %21 = arith.maximumf %19, %20 : vector<4x32xf32>
    %c0_15 = arith.constant 0 : index
    %c0_16 = arith.constant 0 : index
    %22 = vector.load %arg5[%c0_15, %c0_16] : memref<1x32xf32, #tpu.memory_space<vmem>>, vector<1x32xf32>
    %cst_17 = arith.constant dense<0.000000e+00> : vector<1x4xf32>
    %23 = tpu.matmul %22, %21, %cst_17 {dimension_numbers = #tpu.dot_dimension_numbers<[1], [1], [0], [0], [0, 0, 1, 0], [], []>} : vector<1x32xf32>, vector<4x32xf32>, vector<1x4xf32> -> vector<1x4xf32>
    %c0_18 = arith.constant 0 : index
    %c0_19 = arith.constant 0 : index
    %24 = vector.load %arg6[%c0_18, %c0_19] : memref<1x1xf32, #tpu.memory_space<vmem>>, vector<1x1xf32>
    %25 = vector.broadcast %24 : vector<1x1xf32> to vector<1x4xf32>
    %26 = arith.addf %23, %25 : vector<1x4xf32>
    %cst_20 = arith.constant 0.000000e+00 : f32
    %27 = vector.broadcast %cst_20 : f32 to vector<1x4xf32>
    %28 = arith.subf %27, %26 : vector<1x4xf32>
    %29 = math.exp %28 : vector<1x4xf32>
    %cst_21 = arith.constant 1.000000e+00 : f32
    %30 = vector.broadcast %cst_21 : f32 to vector<1x4xf32>
    %31 = arith.addf %30, %29 : vector<1x4xf32>
    %cst_22 = arith.constant 1.000000e+00 : f32
    %32 = vector.broadcast %cst_22 : f32 to vector<1x4xf32>
    %33 = arith.divf %32, %31 : vector<1x4xf32>
    %c0_23 = arith.constant 0 : index
    %c0_24 = arith.constant 0 : index
    %34 = vector.load %arg7[%c0_23, %c0_24] : memref<1x4xf32, #tpu.memory_space<vmem>>, vector<1x4xf32>
    tpu.vector_store %arg7[%c0_23, %c0_24], %33 {strides = array<i32>} : memref<1x4xf32, #tpu.memory_space<vmem>>, vector<1x4xf32>,
    return
  }
  func.func @transform_0(%arg0: i32) -> (i32, i32, i32) {
    %c0_i32 = arith.constant 0 : i32
    %c0_i32_0 = arith.constant 0 : i32
    %c0_i32_1 = arith.constant 0 : i32
    return %arg0, %c0_i32, %c0_i32_0 : i32, i32, i32
  }
  func.func @transform_1(%arg0: i32) -> (i32, i32, i32) {
    %c0_i32 = arith.constant 0 : i32
    %c0_i32_0 = arith.constant 0 : i32
    %c0_i32_1 = arith.constant 0 : i32
    return %arg0, %c0_i32, %c0_i32_0 : i32, i32, i32
  }
  func.func @transform_2(%arg0: i32) -> (i32, i32) {
    %c0_i32 = arith.constant 0 : i32
    %c0_i32_0 = arith.constant 0 : i32
    %c0_i32_1 = arith.constant 0 : i32
    return %c0_i32, %c0_i32_0 : i32, i32
  }
  func.func @transform_3(%arg0: i32) -> (i32, i32) {
    %c0_i32 = arith.constant 0 : i32
    %c0_i32_0 = arith.constant 0 : i32
    %c0_i32_1 = arith.constant 0 : i32
    return %c0_i32, %c0_i32_0 : i32, i32
  }
  func.func @transform_4(%arg0: i32) -> (i32, i32) {
    %c0_i32 = arith.constant 0 : i32
    %c0_i32_0 = arith.constant 0 : i32
    %c0_i32_1 = arith.constant 0 : i32
    return %c0_i32, %c0_i32_0 : i32, i32
  }
  func.func @transform_5(%arg0: i32) -> (i32, i32) {
    %c0_i32 = arith.constant 0 : i32
    %c0_i32_0 = arith.constant 0 : i32
    %c0_i32_1 = arith.constant 0 : i32
    return %c0_i32, %c0_i32_0 : i32, i32
  }
  func.func @transform_6(%arg0: i32) -> (i32, i32) {
    %c0_i32 = arith.constant 0 : i32
    %c0_i32_0 = arith.constant 0 : i32
    return %c0_i32, %arg0 : i32, i32
  }
}

</mosaic_0001>

<bundles_post_ra>
// kernel: tpu_custom_call.1
= control target key start
LH: loop header
LB: loop body
LE: loop exit
PB: predicated region body
PF: predicated region fallthrough
CT: control target
= control target key end

     0   :  { %s580_s0 = inlined_call_operand.vmem [shape: f32[4,16,8], index: 0, kind: input, shape index: {}]   ;;  %s581_s1 = inlined_call_operand.vmem [shape: f32[4,16,8], index: 1, kind: input, shape index: {}]   ;;  %s582_s2 = inlined_call_operand.vmem [shape: f32[8,32], index: 2, kind: input, shape index: {}]   ;;  %s583_s3 = inlined_call_operand.vmem [shape: f32[1,32], index: 3, kind: input, shape index: {}]   ;;  %s584_s4 = inlined_call_operand.vmem [shape: f32[1,32], index: 4, kind: input, shape index: {}]   ;;  %s585_s5 = inlined_call_operand.<no memory space> [shape: f32[1,1], index: 5, kind: input, shape index: {}]   ;;  %s586_s6 = inlined_call_operand.hbm [shape: f32[1,4], index: 6, kind: output, shape index: {}]  }
   0x1   :  { %v11_v0 = vstv %s585_s5 }
   0x2   :  { %12 = vst [vmem:[#allocation2] sm:$0x1] %v11_v0 }
   0x3   :  { %v195_v1 = vld [vmem:[%s582_s2] sm:$0xff]  ;;  %v27_v3 = vld [vmem:[%s580_s0 + $0x8] sm:$0xff]  ;;  %v453_v4 = vmov 0.0   ;;  %vm454_vm0 = vmmov 0   ;;  %vm50_vm1 = vcmask 64512   ;;  %v28_v7 = vld [vmem:[%s580_s0 + $0x10] sm:$0xff] }
   0x4   :  { %v26_v2 = vld [vmem:[%s580_s0] sm:$0xff]  ;;  %404 = vmatprep.subr.mxu0 %v453_v4  ;;  %406 = vmatprep.mubr.msk.f32.mxu0 %vm454_vm0, %v453_v4  ;;  %v88_v6 = vmul.f32 %v27_v3, %v27_v3  ;;  %v29_v8 = vld [vmem:[%s580_s0 + $0x18] sm:$0xff]  ;;  %v31_v10 = vld [vmem:[%s580_s0 + $0x28] sm:$0xff]  ;;  %v89_v14 = vmul.f32 %v28_v7, %v28_v7 }
   0x5   :  { %v87_v5 = vmul.f32 %v26_v2, %v26_v2  ;;  %405 = vmatpush3.msra.mxu0 %v195_v1  ;;  %409 = vmatprep.subr.mxu1 %v453_v4  ;;  %v30_v9 = vld [vmem:[%s580_s0 + $0x20] sm:$0xff]  ;;  %v32_v13 = vld [vmem:[%s580_s0 + $0x30] sm:$0xff]  ;;  %v90_v15 = vmul.f32 %v29_v8, %v29_v8 }
   0x6   :  { %411 = vmatprep.mubr.msk.f32.mxu1 %vm454_vm0, %v453_v4  ;;  %v96_v12 = vsel %vm50_vm1, %v88_v6, 0.0 }
   0x7   :  { %v95_v11 = vsel %vm50_vm1, %v87_v5, 0.0 }
   0x8   :  { %13 = vsyncpa [#allocation4], 0  ;;  %v33_v16 = vld [vmem:[%s580_s0 + $0x38] sm:$0xff]  ;;  %v91_v17 = vmul.f32 %v30_v9, %v30_v9  ;;  %v92_v18 = vmul.f32 %v31_v10, %v31_v10  ;;  %v97_v19 = vadd.f32 %v96_v12, %v95_v11  ;;  %v93_v20 = vmul.f32 %v32_v13, %v32_v13  ;;  %v34_v25 = vld [vmem:[%s581_s1] sm:$0xff] }
   0x9   :  { %v94_v21 = vmul.f32 %v33_v16, %v33_v16  ;;  %v104_v22 = vsel %vm50_vm1, %v89_v14, 0.0  ;;  %v105_v23 = vsel %vm50_vm1, %v90_v15, 0.0  ;;  %v35_v26 = vld [vmem:[%s581_s1 + $0x8] sm:$0xff]  ;;  %v42_v30 = vmul.f32 %v34_v25, %v26_v2  ;;  %v36_v36 = vld [vmem:[%s581_s1 + $0x10] sm:$0xff]  ;;  %v37_v37 = vld [vmem:[%s581_s1 + $0x18] sm:$0xff] }
   0xa   :  { %v113_v24 = vsel %vm50_vm1, %v91_v17, 0.0  ;;  %v98_v27 = vrot.slane %v97_v19, 4  ;;  %v106_v28 = vadd.f32 %v105_v23, %v104_v22  ;;  %v114_v29 = vsel %vm50_vm1, %v92_v18, 0.0  ;;  %v38_v41 = vld [vmem:[%s581_s1 + $0x20] sm:$0xff]  ;;  %v39_v42 = vld [vmem:[%s581_s1 + $0x28] sm:$0xff]  ;;  %v40_v47 = vld [vmem:[%s581_s1 + $0x30] sm:$0xff] }
   0xb   :  { %v43_v31 = vmul.f32 %v35_v26, %v27_v3  ;;  %v122_v32 = vsel %vm50_vm1, %v93_v20, 0.0  ;;  %v115_v34 = vadd.f32 %v114_v29, %v113_v24  ;;  %v123_v35 = vsel %vm50_vm1, %v94_v21, 0.0  ;;  %v41_v48 = vld [vmem:[%s581_s1 + $0x38] sm:$0xff] }
   0xc   :  { %v107_v33 = vrot.slane %v106_v28, 4  ;;  %v99_v38 = vadd.f32 %v98_v27, %v97_v19  ;;  %v124_v40 = vadd.f32 %v123_v35, %v122_v32  ;;  %v44_v43 = vmul.f32 %v36_v36, %v28_v7 }
   0xd   :  { %v116_v39 = vrot.slane %v115_v34, 4  ;;  %v45_v44 = vmul.f32 %v37_v37, %v29_v8  ;;  %v51_v45 = vsel %vm50_vm1, %v42_v30, 0.0  ;;  %v52_v46 = vsel %vm50_vm1, %v43_v31, 0.0 }
   0xe   :  { %v46_v49 = vmul.f32 %v38_v41, %v30_v9  ;;  %v47_v50 = vmul.f32 %v39_v42, %v31_v10  ;;  %v108_v51 = vadd.f32 %v107_v33, %v106_v28  ;;  %v125_v52 = vrot.slane %v124_v40, 4 }
   0xf   :  { %v48_v53 = vmul.f32 %v40_v47, %v32_v13  ;;  %v49_v54 = vmul.f32 %v41_v48, %v33_v16  ;;  %v53_v55 = vadd.f32 %v52_v46, %v51_v45  ;;  %v100_v56 = vrot.slane %v99_v38, 2 }
  0x10   :  { %v117_v57 = vadd.f32 %v116_v39, %v115_v34  ;;  %v126_v58 = vadd.f32 %v125_v52, %v124_v40  ;;  %v60_v59 = vsel %vm50_vm1, %v44_v43, 0.0  ;;  %v61_v60 = vsel %vm50_vm1, %v45_v44, 0.0 }
  0x11   :  { %v131_v61 = vmul.f32 %v34_v25, %v34_v25  ;;  %v132_v62 = vmul.f32 %v35_v26, %v35_v26  ;;  %v69_v63 = vsel %vm50_vm1, %v46_v49, 0.0  ;;  %v70_v0 = vsel %vm50_vm1, %v47_v50, 0.0 }
  0x12   :  { %v109_v1 = vrot.slane %v108_v51, 2  ;;  %v133_v2 = vmul.f32 %v36_v36, %v36_v36  ;;  %v134_v3 = vmul.f32 %v37_v37, %v37_v37  ;;  %v135_v4 = vmul.f32 %v38_v41, %v38_v41 }
  0x13   :  { %v136_v5 = vmul.f32 %v39_v42, %v39_v42  ;;  %v137_v6 = vmul.f32 %v40_v47, %v40_v47  ;;  %v101_v7 = vadd.f32 %v100_v56, %v99_v38  ;;  %v118_v8 = vrot.slane %v117_v57, 2 }
  0x14   :  { %v127_v9 = vrot.slane %v126_v58, 2  ;;  %v138_v10 = vmul.f32 %v41_v48, %v41_v48  ;;  %v139_v11 = vsel %vm50_vm1, %v131_v61, 0.0  ;;  %v140_v12 = vsel %vm50_vm1, %v132_v62, 0.0 }
  0x15   :  { %v148_v13 = vsel %vm50_vm1, %v133_v2, 0.0  ;;  %v149_v14 = vsel %vm50_vm1, %v134_v3, 0.0  ;;  %v78_v15 = vsel %vm50_vm1, %v48_v53, 0.0  ;;  %v110_v16 = vadd.f32 %v109_v1, %v108_v51 }
  0x16   :  { %v141_v17 = vadd.f32 %v140_v12, %v139_v11  ;;  %v150_v18 = vadd.f32 %v149_v14, %v148_v13  ;;  %v157_v19 = vsel %vm50_vm1, %v135_v4, 0.0  ;;  %v158_v20 = vsel %vm50_vm1, %v136_v5, 0.0 }
  0x17   :  { %v166_v21 = vsel %vm50_vm1, %v137_v6, 0.0  ;;  %v167_v22 = vsel %vm50_vm1, %v138_v10, 0.0  ;;  %v119_v23 = vadd.f32 %v118_v8, %v117_v57  ;;  %v159_v26 = vadd.f32 %v158_v20, %v157_v19 }
  0x18   :  { %v142_v24 = vrot.slane %v141_v17, 4  ;;  %v151_v25 = vrot.slane %v150_v18, 4  ;;  %v79_v27 = vsel %vm50_vm1, %v49_v54, 0.0  ;;  %v102_v28 = vrot.slane %v101_v7, 1 }
  0x19   :  { %v128_v29 = vadd.f32 %v127_v9, %v126_v58  ;;  %v168_v30 = vadd.f32 %v167_v22, %v166_v21  ;;  %v111_v31 = vrot.slane %v110_v16, 1  ;;  %v160_v34 = vrot.slane %v159_v26, 4 }
  0x1a   :  { %v143_v32 = vadd.f32 %v142_v24, %v141_v17  ;;  %v152_v33 = vadd.f32 %v151_v25, %v150_v18  ;;  %v54_v35 = vrot.slane %v53_v55, 4  ;;  %v62_v36 = vadd.f32 %v61_v60, %v60_v59 }
  0x1b   :  { %v71_v37 = vadd.f32 %v70_v0, %v69_v63  ;;  %v169_v38 = vrot.slane %v168_v30, 4  ;;  %v120_v39 = vrot.slane %v119_v23, 1  ;;  %v161_v42 = vadd.f32 %v160_v34, %v159_v26 }
  0x1c   :  { %v144_v40 = vrot.slane %v143_v32, 2  ;;  %v153_v41 = vrot.slane %v152_v33, 2  ;;  %v80_v43 = vadd.f32 %v79_v27, %v78_v15  ;;  %v103_v44 = vadd.f32 %v102_v28, %v101_v7 }
  0x1d   :  { %v129_v45 = vrot.slane %v128_v29, 1  ;;  %v170_v46 = vadd.f32 %v169_v38, %v168_v30  ;;  %v112_v47 = vadd.f32 %v111_v31, %v110_v16  ;;  %v162_v50 = vrot.slane %v161_v42, 2 }
  0x1e   :  { %v145_v48 = vadd.f32 %v144_v40, %v143_v32  ;;  %v154_v49 = vadd.f32 %v153_v41, %v152_v33  ;;  %v55_v51 = vadd.f32 %v54_v35, %v53_v55  ;;  %v63_v52 = vrot.slane %v62_v36, 4 }
  0x1f   :  { %v72_v53 = vrot.slane %v71_v37, 4  ;;  %v171_v54 = vrot.slane %v170_v46, 2  ;;  %v121_v56 = vadd.f32 %v120_v39, %v119_v23  ;;  %v163_v59 = vadd.f32 %v162_v50, %v161_v42 }
  0x20   :  { %v146_v57 = vrot.slane %v145_v48, 1  ;;  %v155_v58 = vrot.slane %v154_v49, 1  ;;  %v81_v60 = vrot.slane %v80_v43, 4  ;;  %v130_v61 = vadd.f32 %v129_v45, %v128_v29 }
  0x21   :  { %v172_v62 = vadd.f32 %v171_v54, %v170_v46  ;;  %v175_v63 = vmax.f32 %v103_v44, 1e-16  ;;  %v164_v2 = vrot.slane %v163_v59, 1  ;;  %v176_v3 = vmax.f32 %v112_v47, 1e-16 }
  0x22   :  { %v147_v0 = vadd.f32 %v146_v57, %v145_v48  ;;  %v156_v1 = vadd.f32 %v155_v58, %v154_v49  ;;  %v64_v4 = vadd.f32 %v63_v52, %v62_v36  ;;  %v73_v5 = vadd.f32 %v72_v53, %v71_v37  ;;  %v287_v46 = vld [vmem:[#allocation2] sm:$0x1] }
  0x23   :  { %v173_v6 = vrot.slane %v172_v62, 1  ;;  %v165_v7 = vadd.f32 %v164_v2, %v163_v59  ;;  %v177_v55 = vmax.f32 %v121_v56, 1e-16  ;;  %v82_v10 = vadd.f32 %v81_v60, %v80_v43  ;;  %v396_v48 = vld [vmem:[%s583_s3] ss:$0 sm:$0xff]  ;;  %s456_s3 = smov [#allocation3]  }
  0x24   :  { %v179_v8 = vmax.f32 %v147_v0, 1e-16  ;;  %v180_v9 = vmax.f32 %v156_v1, 1e-16  ;;  %v178_v12 = vmax.f32 %v130_v61, 1e-16  ;;  %v293_v54 = vlaneseq }
  0x25   :  { %v174_v11 = vadd.f32 %v173_v6, %v172_v62  ;;  %v56_v13 = vrot.slane %v55_v51, 2  ;;  %v181_v14 = vmax.f32 %v165_v7, 1e-16  ;;  %v65_v17 = vrot.slane %v64_v4, 2  ;;  %v286_v53 = vld [vmem:[%s584_s4] sm:$0x1] }
  0x26   :  { %v183_v15 = vmul.f32 %v179_v8, %v175_v63  ;;  %v184_v16 = vmul.f32 %v180_v9, %v176_v3  ;;  %v74_v19 = vrot.slane %v73_v5, 2  ;;  %v83_v21 = vrot.slane %v82_v10, 2  ;;  %s388_s7 = sshll.u32 %s456_s3, 4  ;;  %s389_s7 = int_to_ptr.vmem [resolvable:$true] %s388_s7 }
  0x27   :  { %v182_v18 = vmax.f32 %v174_v11, 1e-16  ;;  %v185_v20 = vmul.f32 %v181_v14, %v177_v55  ;;  %v57_v23 = vadd.f32 %v56_v13, %v55_v51  ;;  %v66_v24 = vadd.f32 %v65_v17, %v64_v4  ;;  %s431_s4 = scalar_lea.vmem %s389_s7, 16  ;;  %s435_s8 = scalar_lea.vmem %s389_s7, 32 }
  0x28   :  { %419 = vrsqrt.f32 %v183_v15  ;;  %v75_v25 = vadd.f32 %v74_v19, %v73_v5  ;;  %v84_v26 = vadd.f32 %v83_v21, %v82_v10  ;;  %vm207_vm2 = vcmask 1041409   ;;  %p432_p0 = scmp.ne.s32.totalorder %s389_s7, %s431_s4  ;;  %p436_p1 = scmp.lt.s32.totalorder %s389_s7, %s389_s7 }
  0x29   :  { %v186_v22 = vmul.f32 %v182_v18, %v178_v12  ;;  %421 = vrsqrt.f32 %v184_v16  ;;  %v58_v27 = vrot.slane %v57_v23, 1  ;;  %v67_v28 = vrot.slane %v66_v24, 1  ;;  %p437_p2 = scmp.lt.s32.totalorder %s435_s8, %s431_s4 }
  0x2a   :  { %423 = vrsqrt.f32 %v185_v20  ;;  %v76_v29 = vrot.slane %v75_v25, 1  ;;  %v85_v30 = vrot.slane %v84_v26, 1  ;;  %vm209_vm3 = vcmask 1042434  }
  0x2b   :  { %425 = vrsqrt.f32 %v186_v22  ;;  %v59_v31 = vadd.f32 %v58_v27, %v57_v23  ;;  %v68_v32 = vadd.f32 %v67_v28, %v66_v24  ;;  %vm211_vm4 = vcmask 1043459   ;;  %p438_p3 = por %p437_p2, %p436_p1 }
  0x2c   :  { %v77_v33 = vadd.f32 %v76_v29, %v75_v25  ;;  %v86_v35 = vadd.f32 %v85_v30, %v84_v26  ;;  %v455_v47 = vmov 0   ;;  %vm297_vm5 = vcmask 261120  }
  0x2d   :  { %418 = vset.pattern.permute.xlu0 %v455_v47  ;;  %v294_v56 = vshrl.u32 %v293_v54, 7  ;;  %vm380_vm6 = vcmask 24576   ;;  %p439_p4 = pnand %p438_p3, %p432_p0 }
  0x2e   :  { %290 = vperm.xlu0 %418, %v287_v46  }
  0x2f   :  { %v295_v57 = vsub.s32 0, %v294_v56 }
  0x35   :  { %v420_v34 = vpop.eup %419 }
  0x36   :  { %v422_v36 = vpop.eup %421  ;;  %v191_v37 = vmul.f32 %v420_v34, %v59_v31 }
  0x37   :  { %v424_v38 = vpop.eup %423  ;;  %v192_v39 = vmul.f32 %v422_v36, %v68_v32 }
  0x38   :  { %v426_v40 = vpop.eup %425  ;;  %v193_v41 = vmul.f32 %v424_v38, %v77_v33 }
  0x39   :  { %v194_v42 = vmul.f32 %v426_v40, %v86_v35  ;;  %v208_v43 = vsel %vm207_vm2, %v192_v39, %v191_v37 }
  0x3a   :  { %v210_v44 = vsel %vm209_vm3, %v193_v41, %v208_v43 }
  0x3b   :  { %v212_v45 = vsel %vm211_vm4, %v194_v42, %v210_v44 }
  0x3c   :  { %407 = vmatmul.mubr.msk.f32.vlgmr.msra.gmra.mxu0 %vm50_vm1, %v212_v45 }
  0xa9   :  { %v291_v58 = vpop.permute.xlu0 %290 }
  0xaa   :  { %v296_v59 = vrot.slane %v291_v58, %v295_v57 }
  0xfc   :  { %v281_v49 = vpop.f32.mrf.mxu0 }
  0xfd   :  { %v282_v50 = vadd.f32 %v396_v48, %v281_v49 }
  0xfe   :  { %v408_v51 = vpop.f32.mrf.mxu0 }
  0xff   :  { %v285_v52 = vmax.f32 %v282_v50, 0.0 }
 0x101   :  { %410 = vmatpush3.xpose.msk.msra.mxu1 %vm297_vm5, %v285_v52 }
 0x104   :  { %412 = vmatmul.mubr.msk.f32.vlgmr.msra.gmra.mxu1 %vm297_vm5, %v286_v53 }
 0x1c4   :  { %v370_v60 = vpop.f32.mrf.mxu1 }
 0x1c5   :  { %v371_v61 = vadd.f32 %v370_v60, %v296_v59 }
 0x1c6   :  { %v413_v62 = vpop.f32.mrf.mxu1 }
 0x1c7   :  { %v374_v63 = vsub.f32 0.0, %v371_v61 }
 0x1c9   :  { %v375_v0 = vmul.f32 1.442695, %v374_v63 }
 0x1cb   :  { %427 = vpow2.f32 %v375_v0 }
 0x1d8   :  { %v428_v1 = vpop.eup %427 }
 0x1d9   :  { %v377_v2 = vadd.f32 1.0, %v428_v1 }
 0x1db   :  { %429 = vrcp.f32 %v377_v2 }
 0x1e8   :  { %v430_v3 = vpop.eup %429 }
 0x1e9   :  { %381 = vst.msk [vmem:[#allocation3] sm:$0x1] %vm380_vm6, %v430_v3 }
 0x1ea   :  { %442 = shalt.err (!%p439_p4)
}
 0x1eb   :  { %391 = dma.vmem_to_hbm [thread:$0]  %s389_s7, 16, %s586_s6, [#allocation4]  }
 0x1ec   :  { %451 = dma.done.wait [#allocation4], 16  }
 0x1ed   :  { %452 = vsyncadd [#allocation4], 4294967280 }
 0x1ee   :  { %395 = vsyncpa [#allocation4], 1 }

</bundles_post_ra>
